<compile_context>
chip_gen: v7x
topology: tpu7x:2x2x1
jax: 0.10.0
libtpu: 0.0.40
codegen_flags: <defaults>
</compile_context>

<pallas_src>
import functools
import math

import jax
import jax.numpy as jnp
from jax import lax
from jax.experimental import pallas as pl
from jax.experimental.pallas import tpu as pltpu

EPS = 1e-6


def _layer_norm(x, gamma, beta, d):
    # Matches the PyTorch module: unbiased (d-1) variance, divide by (std+eps).
    mean = jnp.mean(x, axis=-1, keepdims=True)
    var = jnp.sum((x - mean) ** 2, axis=-1, keepdims=True) * (1.0 / (d - 1))
    std = jnp.sqrt(var)
    inv = pl.reciprocal(std + EPS, approx=False)
    return gamma * ((x - mean) * inv) + beta


# --------------------- pass 1: LN1 + QKV projection ---------------------
def qkv_kernel(x_ref, g_ref, b_ref,
               wq_ref, bq_ref, wk_ref, bk_ref, wv_ref, bv_ref,
               q_ref, kv_ref, *, n_heads):
    x = x_ref[0].astype(jnp.float32)                     # (TS, D)
    d = x.shape[-1]
    d_k = d // n_heads
    xn = _layer_norm(x, g_ref[...], b_ref[...], d)       # f32 elementwise math
    xnb = xn.astype(jnp.bfloat16)                        # bf16 MXU operand

    # D-wide bf16 matmuls with f32 accumulation; 1/sqrt(d_k) is already folded
    # into wq/bq by the wrapper.
    q = jnp.dot(xnb, wq_ref[...], preferred_element_type=jnp.float32) + bq_ref[...]
    k = jnp.dot(xnb, wk_ref[...], preferred_element_type=jnp.float32) + bk_ref[...]
    v = jnp.dot(xnb, wv_ref[...], preferred_element_type=jnp.float32) + bv_ref[...]

    # One-time head split into head-major layout (bf16 halves the HBM
    # round-trip); the attention pass then only indexes leading dims.
    for h in range(n_heads):
        sl = slice(h * d_k, (h + 1) * d_k)
        q_ref[0, h] = q[:, sl].astype(jnp.bfloat16)
        kv_ref[0, 0, h] = k[:, sl].astype(jnp.bfloat16)
        kv_ref[0, 1, h] = v[:, sl].astype(jnp.bfloat16)


# ------- pass 2: attention + out-proj + residual + LN2 + FFN + residual -------
def attn_ffn_kernel(x_ref, q_ref, kv_ref,
                    wo_ref, bo_ref,
                    ln2_g_ref, ln2_b_ref,
                    w1_ref, b1_ref, w2_ref, b2_ref,
                    o_ref, *, n_heads, s_valid):
    x = x_ref[0].astype(jnp.float32)                     # (TQ, D)
    tq, d = x.shape
    s_pad = kv_ref.shape[3]

    # Key mask only exists (trace-time) when the sequence was padded.
    if s_valid < s_pad:
        col = lax.broadcasted_iota(jnp.int32, (tq, s_pad), 1)
        key_mask = col < s_valid
    else:
        key_mask = None

    def head_body(h, acc):
        q_h = q_ref[0, h]                                # (TQ, d_k) bf16
        k_h = kv_ref[0, 0, h]                            # (S,  d_k) bf16
        v_h = kv_ref[0, 1, h]                            # (S,  d_k) bf16
        # scores (TQ, S) = q_h @ k_h^T ; scale already folded into q.
        scores = lax.dot_general(q_h, k_h, (((1,), (1,)), ((), ())),
                                 preferred_element_type=jnp.float32)
        if key_mask is not None:
            scores = jnp.where(key_mask, scores, -1e30)
        m = jnp.max(scores, axis=-1, keepdims=True)
        e = jnp.exp(scores - m)                          # mask=None in reference
        p = e * pl.reciprocal(jnp.sum(e, axis=-1, keepdims=True), approx=True)
        ctx = jnp.dot(p.astype(jnp.bfloat16), v_h,
                      preferred_element_type=jnp.float32)           # (TQ, d_k)
        # Fold the output projection into the per-head accumulation
        # (wo_ref is (H, d_k, D)): removes the head concat entirely.
        return acc + jnp.dot(ctx.astype(jnp.bfloat16), wo_ref[h],
                             preferred_element_type=jnp.float32)

    # n_heads is small & static: full unroll gives the scheduler cross-head
    # visibility (overlap q@k^T of head h+1 with softmax / p@v of head h).
    acc = lax.fori_loop(0, n_heads, head_body,
                        jnp.zeros((tq, d), jnp.float32), unroll=True)

    x1 = x + acc + bo_ref[...]                           # residual (dropout p=0)

    xn2 = _layer_norm(x1, ln2_g_ref[...], ln2_b_ref[...], d)
    hdn = jnp.dot(xn2.astype(jnp.bfloat16), w1_ref[...],
                  preferred_element_type=jnp.float32) + b1_ref[...]
    hdn = jnp.maximum(hdn, 0.0)                          # ReLU
    ff = jnp.dot(hdn.astype(jnp.bfloat16), w2_ref[...],
                 preferred_element_type=jnp.float32) + b2_ref[...]
    o_ref[0] = (x1 + ff).astype(o_ref.dtype)             # residual (dropout p=0)


def _seq_tiling(s, vmem_cap_bytes):
    """Returns (seq_tile, padded_seq_len)."""
    # Generation-aware cap: v7x has 64 MiB/TC, v5e/v6e have 128 MiB.
    ts_cap = 256 if vmem_cap_bytes <= 72 * (1 << 20) else 512
    # Keep the two (ts, S) f32 softmax slabs under ~8 MiB (ts*S byte budget).
    ts_cap = max(8, min(ts_cap, (8 << 20) // max(8 * s, 1)))
    if s <= ts_cap:
        return s, s
    for c in (512, 256, 128, 64, 32, 16, 8):
        if c <= ts_cap and s % c == 0:
            return c, s
    # No clean divisor: pad the sequence to a multiple of the tile (padded key
    # columns are masked in pass 2) rather than collapsing to ts=S.
    ts = max(8, (min(ts_cap, 128) // 8) * 8)
    return ts, ((s + ts - 1) // ts) * ts


def encoder_layer(x, params, n_heads):
    B, S, D = x.shape
    d_k = D // n_heads
    d_ff = params["w1"].shape[-1]
    scale = 1.0 / math.sqrt(d_k)

    try:
        vmem_cap = int(pltpu.get_tpu_info().vmem_capacity_bytes)
    except Exception:
        vmem_cap = 64 * (1 << 20)        # conservative (v7x-sized) fallback

    ts, s_pad = _seq_tiling(S, vmem_cap)
    n_t = s_pad // ts
    x_in = x if s_pad == S else jnp.pad(x, ((0, 0), (0, s_pad - S), (0, 0)))

    # bf16 MXU operand weights, cast ONCE here (not per tile).  The 1/sqrt(d_k)
    # attention scale is folded into wq/bq (scaled in f32, then cast).
    bf = jnp.bfloat16
    wq = (params["wq"] * scale).astype(bf)
    bq = params["bq"] * scale                            # bias stays f32
    wk = params["wk"].astype(bf)
    wv = params["wv"].astype(bf)
    wo_r = params["wo"].reshape(n_heads, d_k, D).astype(bf)   # per-head rows of wo
    w1 = params["w1"].astype(bf)
    w2 = params["w2"].astype(bf)

    # NOTE: for production, D (last dim of the output BlockSpec) should be a
    # multiple of 128 for lane-dense stores; the tiny test D=32 uses full dims.
    cparams = pltpu.CompilerParams(
        dimension_semantics=("parallel", "parallel"),
        vmem_limit_bytes=min(int(vmem_cap * 3 // 4), 110 * (1 << 20)))

    def full_spec(shape):
        nd = len(shape)
        return pl.BlockSpec(shape, lambda b, s, _nd=nd: (0,) * _nd)

    # ---------------- pass 1: LN1 + QKV ----------------
    p1_params = [params["ln1_g"], params["ln1_b"],
                 wq, bq, wk, params["bk"], wv, params["bv"]]
    p1_in_specs = [pl.BlockSpec((1, ts, D), lambda b, s: (b, s, 0))]
    p1_in_specs += [full_spec(p.shape) for p in p1_params]

    q_spec = pl.BlockSpec((1, n_heads, ts, d_k), lambda b, s: (b, 0, s, 0))
    kv_spec = pl.BlockSpec((1, 2, n_heads, ts, d_k), lambda b, s: (b, 0, 0, s, 0))
    q_shape = jax.ShapeDtypeStruct((B, n_heads, s_pad, d_k), jnp.bfloat16)
    kv_shape = jax.ShapeDtypeStruct((B, 2, n_heads, s_pad, d_k), jnp.bfloat16)

    qkv_cost = pl.CostEstimate(
        flops=int(2 * B * s_pad * D * 3 * D + 10 * B * s_pad * D),
        transcendentals=int(2 * B * s_pad),
        bytes_accessed=int(4 * B * s_pad * D + 2 * 3 * B * s_pad * D
                           + 2 * 3 * D * D + 4 * 8 * D))

    q, kv = pl.pallas_call(
        functools.partial(qkv_kernel, n_heads=n_heads),
        out_shape=(q_shape, kv_shape),
        grid_spec=pltpu.PrefetchScalarGridSpec(
            num_scalar_prefetch=0,
            grid=(B, n_t),
            in_specs=p1_in_specs,
            out_specs=(q_spec, kv_spec)),
        compiler_params=cparams,
        cost_estimate=qkv_cost,
    )(x_in, *p1_params)

    # -------- pass 2: attention + out-proj + FFN + residuals, query-tiled --------
    p2_params = [wo_r, params["bo"], params["ln2_g"], params["ln2_b"],
                 w1, params["b1"], w2, params["b2"]]
    p2_in_specs = [
        pl.BlockSpec((1, ts, D), lambda b, qi: (b, qi, 0)),                 # x tile
        pl.BlockSpec((1, n_heads, ts, d_k), lambda b, qi: (b, 0, qi, 0)),   # q tile
        pl.BlockSpec((1, 2, n_heads, s_pad, d_k),
                     lambda b, qi: (b, 0, 0, 0, 0)),                        # k,v full
    ]
    p2_in_specs += [full_spec(p.shape) for p in p2_params]

    attn_cost = pl.CostEstimate(
        flops=int(4 * B * s_pad * s_pad * D + 2 * B * s_pad * D * D
                  + 4 * B * s_pad * D * d_ff + 20 * B * s_pad * D),
        transcendentals=int(B * n_heads * s_pad * s_pad + 4 * B * s_pad),
        bytes_accessed=int(4 * 2 * B * s_pad * D + 2 * 3 * B * s_pad * D
                           + 2 * (D * D + 2 * D * d_ff) + 4 * (4 * D + d_ff)))

    out = pl.pallas_call(
        functools.partial(attn_ffn_kernel, n_heads=n_heads, s_valid=S),
        out_shape=jax.ShapeDtypeStruct((B, s_pad, D), x.dtype),
        grid_spec=pltpu.PrefetchScalarGridSpec(
            num_scalar_prefetch=0,
            grid=(B, n_t),
            in_specs=p2_in_specs,
            out_specs=pl.BlockSpec((1, ts, D), lambda b, qi: (b, qi, 0))),
        compiler_params=cparams,
        cost_estimate=attn_cost,
    )(x_in, q, kv, *p2_params)

    return out if s_pad == S else out[:, :S, :]


# ---------------- pure-JAX reference for verification ----------------
def encoder_layer_ref(x, params, n_heads):
    B, S, D = x.shape
    d_k = D // n_heads

    def ln(z, g, b):
        mean = jnp.mean(z, axis=-1, keepdims=True)
        var = jnp.sum((z - mean) ** 2, axis=-1, keepdims=True) / (D - 1)
        std = jnp.sqrt(var)
        return g * (z - mean) / (std + EPS) + b

    xn = ln(x, params["ln1_g"], params["ln1_b"])
    q = xn @ params["wq"] + params["bq"]
    k = xn @ params["wk"] + params["bk"]
    v = xn @ params["wv"] + params["bv"]

    def split(t):  # (B,S,D) -> (B,H,S,dk)
        return t.reshape(B, S, n_heads, d_k).transpose(0, 2, 1, 3)

    qh, kh, vh = split(q), split(k), split(v)
    scores = jnp.einsum("bhqd,bhkd->bhqk", qh, kh) / (d_k ** 0.5)
    p = jax.nn.softmax(scores, axis=-1)
    attn = jnp.einsum("bhqk,bhkd->bhqd", p, vh)
    attn = attn.transpose(0, 2, 1, 3).reshape(B, S, D)
    attn = attn @ params["wo"] + params["bo"]
    x1 = x + attn

    xn2 = ln(x1, params["ln2_g"], params["ln2_b"])
    h = jnp.maximum(xn2 @ params["w1"] + params["b1"], 0.0)
    return x1 + (h @ params["w2"] + params["b2"])


def init_params(key, d_model, d_ff):
    ks = jax.random.split(key, 9)
    return {
        "ln1_g": jnp.ones((1, d_model), jnp.float32),
        "ln1_b": jnp.zeros((1, d_model), jnp.float32),
        "wq": jax.random.normal(ks[0], (d_model, d_model), jnp.float32) * 0.05,
        "bq": jax.random.normal(ks[1], (1, d_model), jnp.float32) * 0.01,
        "wk": jax.random.normal(ks[2], (d_model, d_model), jnp.float32) * 0.05,
        "bk": jax.random.normal(ks[3], (1, d_model), jnp.float32) * 0.01,
        "wv": jax.random.normal(ks[4], (d_model, d_model), jnp.float32) * 0.05,
        "bv": jax.random.normal(ks[5], (1, d_model), jnp.float32) * 0.01,
        "wo": jax.random.normal(ks[6], (d_model, d_model), jnp.float32) * 0.05,
        "bo": jnp.zeros((1, d_model), jnp.float32),
        "ln2_g": jnp.ones((1, d_model), jnp.float32),
        "ln2_b": jnp.zeros((1, d_model), jnp.float32),
        "w1": jax.random.normal(ks[7], (d_model, d_ff), jnp.float32) * 0.05,
        "b1": jnp.zeros((1, d_ff), jnp.float32),
        "w2": jax.random.normal(ks[8], (d_ff, d_model), jnp.float32) * 0.05,
        "b2": jnp.zeros((1, d_model), jnp.float32),
    }


if __name__ == "__main__":
    B, S, D, H, D_FF = 2, 8, 32, 4, 64
    key = jax.random.PRNGKey(0)
    kx, kp = jax.random.split(key)
    x = jax.random.normal(kx, (B, S, D), jnp.float32)
    params = init_params(kp, D, D_FF)

    out = encoder_layer(x, params, n_heads=H)
    out = jax.block_until_ready(out)

    ref = encoder_layer_ref(x, params, n_heads=H)
    assert out.shape == (B, S, D)
    err = float(jnp.max(jnp.abs(out - ref)))
    # bf16 MXU operands + bf16 q/k/v intermediates => compare at ~1e-2.
    assert jnp.allclose(out, ref, atol=1e-2, rtol=1e-2), f"max err {err}"
    print("KERNEL_OK")
</pallas_src>

<mosaic_0001>
module attributes {stable_mosaic.version = 11 : i64} {
  func.func @qkv_kernel(%arg0: i32, %arg1: i32, %arg2: memref<1x8x32xf32, #tpu.memory_space<vmem>>, %arg3: memref<1x32xf32, #tpu.memory_space<vmem>>, %arg4: memref<1x32xf32, #tpu.memory_space<vmem>>, %arg5: memref<32x32xbf16, #tpu.memory_space<vmem>>, %arg6: memref<1x32xf32, #tpu.memory_space<vmem>>, %arg7: memref<32x32xbf16, #tpu.memory_space<vmem>>, %arg8: memref<1x32xf32, #tpu.memory_space<vmem>>, %arg9: memref<32x32xbf16, #tpu.memory_space<vmem>>, %arg10: memref<1x32xf32, #tpu.memory_space<vmem>>, %arg11: memref<1x4x8x8xbf16, #tpu.memory_space<vmem>>, %arg12: memref<1x2x4x8x8xbf16, #tpu.memory_space<vmem>>) attributes {dimension_semantics = [#tpu.dimension_semantics<parallel>, #tpu.dimension_semantics<parallel>], iteration_bounds = array<i64: 2, 1>, scalar_prefetch = 0 : i64, scratch_operands = 0 : i64, tpu.core_type = #tpu.core_type<tc>, window_params = [{transform_indices = @transform_0, window_bounds = array<i64: 1, 8, 32>}, {pipeline_mode = #tpu.pipeline_mode<synchronous>, transform_indices = @transform_1, window_bounds = array<i64: 1, 32>}, {pipeline_mode = #tpu.pipeline_mode<synchronous>, transform_indices = @transform_2, window_bounds = array<i64: 1, 32>}, {pipeline_mode = #tpu.pipeline_mode<synchronous>, transform_indices = @transform_3, window_bounds = array<i64: 32, 32>}, {pipeline_mode = #tpu.pipeline_mode<synchronous>, transform_indices = @transform_4, window_bounds = array<i64: 1, 32>}, {pipeline_mode = #tpu.pipeline_mode<synchronous>, transform_indices = @transform_5, window_bounds = array<i64: 32, 32>}, {pipeline_mode = #tpu.pipeline_mode<synchronous>, transform_indices = @transform_6, window_bounds = array<i64: 1, 32>}, {pipeline_mode = #tpu.pipeline_mode<synchronous>, transform_indices = @transform_7, window_bounds = array<i64: 32, 32>}, {pipeline_mode = #tpu.pipeline_mode<synchronous>, transform_indices = @transform_8, window_bounds = array<i64: 1, 32>}, {transform_indices = @transform_9, window_bounds = array<i64: 1, 4, 8, 8>}, {transform_indices = @transform_10, window_bounds = array<i64: 1, 2, 4, 8, 8>}]} {
    %c0 = arith.constant 0 : index
    %c0_0 = arith.constant 0 : index
    %c0_1 = arith.constant 0 : index
    %0 = vector.load %arg2[%c0, %c0_0, %c0_1] : memref<1x8x32xf32, #tpu.memory_space<vmem>>, vector<1x8x32xf32>
    %1 = vector.shape_cast %0 : vector<1x8x32xf32> to vector<8x32xf32>
    %c0_2 = arith.constant 0 : index
    %c0_3 = arith.constant 0 : index
    %2 = vector.load %arg3[%c0_2, %c0_3] : memref<1x32xf32, #tpu.memory_space<vmem>>, vector<1x32xf32>
    %c0_4 = arith.constant 0 : index
    %c0_5 = arith.constant 0 : index
    %3 = vector.load %arg4[%c0_4, %c0_5] : memref<1x32xf32, #tpu.memory_space<vmem>>, vector<1x32xf32>
    %cst = arith.constant dense<0.000000e+00> : vector<8xf32>
    %4 = vector.multi_reduction <add>, %1, %cst [1] : vector<8x32xf32> to vector<8xf32>
    %5 = vector.shape_cast %4 : vector<8xf32> to vector<8x1xf32>
    %cst_6 = arith.constant 3.200000e+01 : f32
    %6 = vector.broadcast %cst_6 : f32 to vector<8x1xf32>
    %7 = arith.divf %5, %6 : vector<8x1xf32>
    %8 = vector.broadcast %7 : vector<8x1xf32> to vector<8x32xf32>
    %9 = arith.subf %1, %8 : vector<8x32xf32>
    %10 = arith.mulf %9, %9 : vector<8x32xf32>
    %cst_7 = arith.constant dense<0.000000e+00> : vector<8xf32>
    %11 = vector.multi_reduction <add>, %10, %cst_7 [1] : vector<8x32xf32> to vector<8xf32>
    %12 = vector.shape_cast %11 : vector<8xf32> to vector<8x1xf32>
    %cst_8 = arith.constant 0.0322580636 : f32
    %13 = vector.broadcast %cst_8 : f32 to vector<8x1xf32>
    %14 = arith.mulf %12, %13 : vector<8x1xf32>
    %15 = math.sqrt %14 : vector<8x1xf32>
    %cst_9 = arith.constant 9.99999997E-7 : f32
    %16 = vector.broadcast %cst_9 : f32 to vector<8x1xf32>
    %17 = arith.addf %15, %16 : vector<8x1xf32>
    %18 = tpu.reciprocal %17 : vector<8x1xf32> -> vector<8x1xf32>
    %19 = vector.broadcast %7 : vector<8x1xf32> to vector<8x32xf32>
    %20 = arith.subf %1, %19 : vector<8x32xf32>
    %21 = vector.broadcast %18 : vector<8x1xf32> to vector<8x32xf32>
    %22 = arith.mulf %20, %21 : vector<8x32xf32>
    %23 = vector.broadcast %2 : vector<1x32xf32> to vector<8x32xf32>
    %24 = arith.mulf %23, %22 : vector<8x32xf32>
    %25 = vector.broadcast %3 : vector<1x32xf32> to vector<8x32xf32>
    %26 = arith.addf %24, %25 : vector<8x32xf32>
    %27 = arith.truncf %26 : vector<8x32xf32> to vector<8x32xbf16>
    %c0_10 = arith.constant 0 : index
    %c0_11 = arith.constant 0 : index
    %28 = vector.load %arg5[%c0_10, %c0_11] : memref<32x32xbf16, #tpu.memory_space<vmem>>, vector<32x32xbf16>
    %cst_12 = arith.constant dense<0.000000e+00> : vector<8x32xf32>
    %29 = tpu.matmul %27, %28, %cst_12 {dimension_numbers = #tpu.dot_dimension_numbers<[1], [0], [0], [1], [0, 0, 1, 1], [], []>} : vector<8x32xbf16>, vector<32x32xbf16>, vector<8x32xf32> -> vector<8x32xf32>
    %c0_13 = arith.constant 0 : index
    %c0_14 = arith.constant 0 : index
    %30 = vector.load %arg6[%c0_13, %c0_14] : memref<1x32xf32, #tpu.memory_space<vmem>>, vector<1x32xf32>
    %31 = vector.broadcast %30 : vector<1x32xf32> to vector<8x32xf32>
    %32 = arith.addf %29, %31 : vector<8x32xf32>
    %c0_15 = arith.constant 0 : index
    %c0_16 = arith.constant 0 : index
    %33 = vector.load %arg7[%c0_15, %c0_16] : memref<32x32xbf16, #tpu.memory_space<vmem>>, vector<32x32xbf16>
    %cst_17 = arith.constant dense<0.000000e+00> : vector<8x32xf32>
    %34 = tpu.matmul %27, %33, %cst_17 {dimension_numbers = #tpu.dot_dimension_numbers<[1], [0], [0], [1], [0, 0, 1, 1], [], []>} : vector<8x32xbf16>, vector<32x32xbf16>, vector<8x32xf32> -> vector<8x32xf32>
    %c0_18 = arith.constant 0 : index
    %c0_19 = arith.constant 0 : index
    %35 = vector.load %arg8[%c0_18, %c0_19] : memref<1x32xf32, #tpu.memory_space<vmem>>, vector<1x32xf32>
    %36 = vector.broadcast %35 : vector<1x32xf32> to vector<8x32xf32>
    %37 = arith.addf %34, %36 : vector<8x32xf32>
    %c0_20 = arith.constant 0 : index
    %c0_21 = arith.constant 0 : index
    %38 = vector.load %arg9[%c0_20, %c0_21] : memref<32x32xbf16, #tpu.memory_space<vmem>>, vector<32x32xbf16>
    %cst_22 = arith.constant dense<0.000000e+00> : vector<8x32xf32>
    %39 = tpu.matmul %27, %38, %cst_22 {dimension_numbers = #tpu.dot_dimension_numbers<[1], [0], [0], [1], [0, 0, 1, 1], [], []>} : vector<8x32xbf16>, vector<32x32xbf16>, vector<8x32xf32> -> vector<8x32xf32>
    %c0_23 = arith.constant 0 : index
    %c0_24 = arith.constant 0 : index
    %40 = vector.load %arg10[%c0_23, %c0_24] : memref<1x32xf32, #tpu.memory_space<vmem>>, vector<1x32xf32>
    %41 = vector.broadcast %40 : vector<1x32xf32> to vector<8x32xf32>
    %42 = arith.addf %39, %41 : vector<8x32xf32>
    %43 = vector.extract_strided_slice %32 {offsets = [0, 0], sizes = [8, 8], strides = [1, 1]} : vector<8x32xf32> to vector<8x8xf32>
    %44 = arith.truncf %43 : vector<8x8xf32> to vector<8x8xbf16>
    %c0_25 = arith.constant 0 : index
    %c0_26 = arith.constant 0 : index
    %c0_27 = arith.constant 0 : index
    %c0_28 = arith.constant 0 : index
    %45 = vector.load %arg11[%c0_25, %c0_26, %c0_27, %c0_28] : memref<1x4x8x8xbf16, #tpu.memory_space<vmem>>, vector<1x1x8x8xbf16>
    %46 = vector.shape_cast %45 : vector<1x1x8x8xbf16> to vector<8x8xbf16>
    %47 = vector.shape_cast %44 : vector<8x8xbf16> to vector<1x1x8x8xbf16>
    tpu.vector_store %arg11[%c0_25, %c0_26, %c0_27, %c0_28], %47 {strides = array<i32>} : memref<1x4x8x8xbf16, #tpu.memory_space<vmem>>, vector<1x1x8x8xbf16>,
    %48 = vector.extract_strided_slice %37 {offsets = [0, 0], sizes = [8, 8], strides = [1, 1]} : vector<8x32xf32> to vector<8x8xf32>
    %49 = arith.truncf %48 : vector<8x8xf32> to vector<8x8xbf16>
    %c0_29 = arith.constant 0 : index
    %c0_30 = arith.constant 0 : index
    %c0_31 = arith.constant 0 : index
    %c0_32 = arith.constant 0 : index
    %c0_33 = arith.constant 0 : index
    %50 = vector.load %arg12[%c0_29, %c0_30, %c0_31, %c0_32, %c0_33] : memref<1x2x4x8x8xbf16, #tpu.memory_space<vmem>>, vector<1x1x1x8x8xbf16>
    %51 = vector.shape_cast %50 : vector<1x1x1x8x8xbf16> to vector<8x8xbf16>
    %52 = vector.shape_cast %49 : vector<8x8xbf16> to vector<1x1x1x8x8xbf16>
    tpu.vector_store %arg12[%c0_29, %c0_30, %c0_31, %c0_32, %c0_33], %52 {strides = array<i32>} : memref<1x2x4x8x8xbf16, #tpu.memory_space<vmem>>, vector<1x1x1x8x8xbf16>,
    %53 = vector.extract_strided_slice %42 {offsets = [0, 0], sizes = [8, 8], strides = [1, 1]} : vector<8x32xf32> to vector<8x8xf32>
    %54 = arith.truncf %53 : vector<8x8xf32> to vector<8x8xbf16>
    %c0_34 = arith.constant 0 : index
    %c1 = arith.constant 1 : index
    %c0_35 = arith.constant 0 : index
    %c0_36 = arith.constant 0 : index
    %c0_37 = arith.constant 0 : index
    %55 = vector.load %arg12[%c0_34, %c1, %c0_35, %c0_36, %c0_37] : memref<1x2x4x8x8xbf16, #tpu.memory_space<vmem>>, vector<1x1x1x8x8xbf16>
    %56 = vector.shape_cast %55 : vector<1x1x1x8x8xbf16> to vector<8x8xbf16>
    %57 = vector.shape_cast %54 : vector<8x8xbf16> to vector<1x1x1x8x8xbf16>
    tpu.vector_store %arg12[%c0_34, %c1, %c0_35, %c0_36, %c0_37], %57 {strides = array<i32>} : memref<1x2x4x8x8xbf16, #tpu.memory_space<vmem>>, vector<1x1x1x8x8xbf16>,
    %58 = vector.extract_strided_slice %32 {offsets = [0, 8], sizes = [8, 8], strides = [1, 1]} : vector<8x32xf32> to vector<8x8xf32>
    %59 = arith.truncf %58 : vector<8x8xf32> to vector<8x8xbf16>
    %c0_38 = arith.constant 0 : index
    %c1_39 = arith.constant 1 : index
    %c0_40 = arith.constant 0 : index
    %c0_41 = arith.constant 0 : index
    %60 = vector.load %arg11[%c0_38, %c1_39, %c0_40, %c0_41] : memref<1x4x8x8xbf16, #tpu.memory_space<vmem>>, vector<1x1x8x8xbf16>
    %61 = vector.shape_cast %60 : vector<1x1x8x8xbf16> to vector<8x8xbf16>
    %62 = vector.shape_cast %59 : vector<8x8xbf16> to vector<1x1x8x8xbf16>
    tpu.vector_store %arg11[%c0_38, %c1_39, %c0_40, %c0_41], %62 {strides = array<i32>} : memref<1x4x8x8xbf16, #tpu.memory_space<vmem>>, vector<1x1x8x8xbf16>,
    %63 = vector.extract_strided_slice %37 {offsets = [0, 8], sizes = [8, 8], strides = [1, 1]} : vector<8x32xf32> to vector<8x8xf32>
    %64 = arith.truncf %63 : vector<8x8xf32> to vector<8x8xbf16>
    %c0_42 = arith.constant 0 : index
    %c0_43 = arith.constant 0 : index
    %c1_44 = arith.constant 1 : index
    %c0_45 = arith.constant 0 : index
    %c0_46 = arith.constant 0 : index
    %65 = vector.load %arg12[%c0_42, %c0_43, %c1_44, %c0_45, %c0_46] : memref<1x2x4x8x8xbf16, #tpu.memory_space<vmem>>, vector<1x1x1x8x8xbf16>
    %66 = vector.shape_cast %65 : vector<1x1x1x8x8xbf16> to vector<8x8xbf16>
    %67 = vector.shape_cast %64 : vector<8x8xbf16> to vector<1x1x1x8x8xbf16>
    tpu.vector_store %arg12[%c0_42, %c0_43, %c1_44, %c0_45, %c0_46], %67 {strides = array<i32>} : memref<1x2x4x8x8xbf16, #tpu.memory_space<vmem>>, vector<1x1x1x8x8xbf16>,
    %68 = vector.extract_strided_slice %42 {offsets = [0, 8], sizes = [8, 8], strides = [1, 1]} : vector<8x32xf32> to vector<8x8xf32>
    %69 = arith.truncf %68 : vector<8x8xf32> to vector<8x8xbf16>
    %c0_47 = arith.constant 0 : index
    %c1_48 = arith.constant 1 : index
    %c1_49 = arith.constant 1 : index
    %c0_50 = arith.constant 0 : index
    %c0_51 = arith.constant 0 : index
    %70 = vector.load %arg12[%c0_47, %c1_48, %c1_49, %c0_50, %c0_51] : memref<1x2x4x8x8xbf16, #tpu.memory_space<vmem>>, vector<1x1x1x8x8xbf16>
    %71 = vector.shape_cast %70 : vector<1x1x1x8x8xbf16> to vector<8x8xbf16>
    %72 = vector.shape_cast %69 : vector<8x8xbf16> to vector<1x1x1x8x8xbf16>
    tpu.vector_store %arg12[%c0_47, %c1_48, %c1_49, %c0_50, %c0_51], %72 {strides = array<i32>} : memref<1x2x4x8x8xbf16, #tpu.memory_space<vmem>>, vector<1x1x1x8x8xbf16>,
    %73 = vector.extract_strided_slice %32 {offsets = [0, 16], sizes = [8, 8], strides = [1, 1]} : vector<8x32xf32> to vector<8x8xf32>
    %74 = arith.truncf %73 : vector<8x8xf32> to vector<8x8xbf16>
    %c0_52 = arith.constant 0 : index
    %c2 = arith.constant 2 : index
    %c0_53 = arith.constant 0 : index
    %c0_54 = arith.constant 0 : index
    %75 = vector.load %arg11[%c0_52, %c2, %c0_53, %c0_54] : memref<1x4x8x8xbf16, #tpu.memory_space<vmem>>, vector<1x1x8x8xbf16>
    %76 = vector.shape_cast %75 : vector<1x1x8x8xbf16> to vector<8x8xbf16>
    %77 = vector.shape_cast %74 : vector<8x8xbf16> to vector<1x1x8x8xbf16>
    tpu.vector_store %arg11[%c0_52, %c2, %c0_53, %c0_54], %77 {strides = array<i32>} : memref<1x4x8x8xbf16, #tpu.memory_space<vmem>>, vector<1x1x8x8xbf16>,
    %78 = vector.extract_strided_slice %37 {offsets = [0, 16], sizes = [8, 8], strides = [1, 1]} : vector<8x32xf32> to vector<8x8xf32>
    %79 = arith.truncf %78 : vector<8x8xf32> to vector<8x8xbf16>
    %c0_55 = arith.constant 0 : index
    %c0_56 = arith.constant 0 : index
    %c2_57 = arith.constant 2 : index
    %c0_58 = arith.constant 0 : index
    %c0_59 = arith.constant 0 : index
    %80 = vector.load %arg12[%c0_55, %c0_56, %c2_57, %c0_58, %c0_59] : memref<1x2x4x8x8xbf16, #tpu.memory_space<vmem>>, vector<1x1x1x8x8xbf16>
    %81 = vector.shape_cast %80 : vector<1x1x1x8x8xbf16> to vector<8x8xbf16>
    %82 = vector.shape_cast %79 : vector<8x8xbf16> to vector<1x1x1x8x8xbf16>
    tpu.vector_store %arg12[%c0_55, %c0_56, %c2_57, %c0_58, %c0_59], %82 {strides = array<i32>} : memref<1x2x4x8x8xbf16, #tpu.memory_space<vmem>>, vector<1x1x1x8x8xbf16>,
    %83 = vector.extract_strided_slice %42 {offsets = [0, 16], sizes = [8, 8], strides = [1, 1]} : vector<8x32xf32> to vector<8x8xf32>
    %84 = arith.truncf %83 : vector<8x8xf32> to vector<8x8xbf16>
    %c0_60 = arith.constant 0 : index
    %c1_61 = arith.constant 1 : index
    %c2_62 = arith.constant 2 : index
    %c0_63 = arith.constant 0 : index
    %c0_64 = arith.constant 0 : index
    %85 = vector.load %arg12[%c0_60, %c1_61, %c2_62, %c0_63, %c0_64] : memref<1x2x4x8x8xbf16, #tpu.memory_space<vmem>>, vector<1x1x1x8x8xbf16>
    %86 = vector.shape_cast %85 : vector<1x1x1x8x8xbf16> to vector<8x8xbf16>
    %87 = vector.shape_cast %84 : vector<8x8xbf16> to vector<1x1x1x8x8xbf16>
    tpu.vector_store %arg12[%c0_60, %c1_61, %c2_62, %c0_63, %c0_64], %87 {strides = array<i32>} : memref<1x2x4x8x8xbf16, #tpu.memory_space<vmem>>, vector<1x1x1x8x8xbf16>,
    %88 = vector.extract_strided_slice %32 {offsets = [0, 24], sizes = [8, 8], strides = [1, 1]} : vector<8x32xf32> to vector<8x8xf32>
    %89 = arith.truncf %88 : vector<8x8xf32> to vector<8x8xbf16>
    %c0_65 = arith.constant 0 : index
    %c3 = arith.constant 3 : index
    %c0_66 = arith.constant 0 : index
    %c0_67 = arith.constant 0 : index
    %90 = vector.load %arg11[%c0_65, %c3, %c0_66, %c0_67] : memref<1x4x8x8xbf16, #tpu.memory_space<vmem>>, vector<1x1x8x8xbf16>
    %91 = vector.shape_cast %90 : vector<1x1x8x8xbf16> to vector<8x8xbf16>
    %92 = vector.shape_cast %89 : vector<8x8xbf16> to vector<1x1x8x8xbf16>
    tpu.vector_store %arg11[%c0_65, %c3, %c0_66, %c0_67], %92 {strides = array<i32>} : memref<1x4x8x8xbf16, #tpu.memory_space<vmem>>, vector<1x1x8x8xbf16>,
    %93 = vector.extract_strided_slice %37 {offsets = [0, 24], sizes = [8, 8], strides = [1, 1]} : vector<8x32xf32> to vector<8x8xf32>
    %94 = arith.truncf %93 : vector<8x8xf32> to vector<8x8xbf16>
    %c0_68 = arith.constant 0 : index
    %c0_69 = arith.constant 0 : index
    %c3_70 = arith.constant 3 : index
    %c0_71 = arith.constant 0 : index
    %c0_72 = arith.constant 0 : index
    %95 = vector.load %arg12[%c0_68, %c0_69, %c3_70, %c0_71, %c0_72] : memref<1x2x4x8x8xbf16, #tpu.memory_space<vmem>>, vector<1x1x1x8x8xbf16>
    %96 = vector.shape_cast %95 : vector<1x1x1x8x8xbf16> to vector<8x8xbf16>
    %97 = vector.shape_cast %94 : vector<8x8xbf16> to vector<1x1x1x8x8xbf16>
    tpu.vector_store %arg12[%c0_68, %c0_69, %c3_70, %c0_71, %c0_72], %97 {strides = array<i32>} : memref<1x2x4x8x8xbf16, #tpu.memory_space<vmem>>, vector<1x1x1x8x8xbf16>,
    %98 = vector.extract_strided_slice %42 {offsets = [0, 24], sizes = [8, 8], strides = [1, 1]} : vector<8x32xf32> to vector<8x8xf32>
    %99 = arith.truncf %98 : vector<8x8xf32> to vector<8x8xbf16>
    %c0_73 = arith.constant 0 : index
    %c1_74 = arith.constant 1 : index
    %c3_75 = arith.constant 3 : index
    %c0_76 = arith.constant 0 : index
    %c0_77 = arith.constant 0 : index
    %100 = vector.load %arg12[%c0_73, %c1_74, %c3_75, %c0_76, %c0_77] : memref<1x2x4x8x8xbf16, #tpu.memory_space<vmem>>, vector<1x1x1x8x8xbf16>
    %101 = vector.shape_cast %100 : vector<1x1x1x8x8xbf16> to vector<8x8xbf16>
    %102 = vector.shape_cast %99 : vector<8x8xbf16> to vector<1x1x1x8x8xbf16>
    tpu.vector_store %arg12[%c0_73, %c1_74, %c3_75, %c0_76, %c0_77], %102 {strides = array<i32>} : memref<1x2x4x8x8xbf16, #tpu.memory_space<vmem>>, vector<1x1x1x8x8xbf16>,
    return
  }
  func.func @transform_0(%arg0: i32, %arg1: i32) -> (i32, i32, i32) {
    %c0_i32 = arith.constant 0 : i32
    %c0_i32_0 = arith.constant 0 : i32
    return %arg0, %arg1, %c0_i32 : i32, i32, i32
  }
  func.func @transform_1(%arg0: i32, %arg1: i32) -> (i32, i32) {
    %c0_i32 = arith.constant 0 : i32
    %c0_i32_0 = arith.constant 0 : i32
    %c0_i32_1 = arith.constant 0 : i32
    return %c0_i32, %c0_i32_0 : i32, i32
  }
  func.func @transform_2(%arg0: i32, %arg1: i32) -> (i32, i32) {
    %c0_i32 = arith.constant 0 : i32
    %c0_i32_0 = arith.constant 0 : i32
    %c0_i32_1 = arith.constant 0 : i32
    return %c0_i32, %c0_i32_0 : i32, i32
  }
  func.func @transform_3(%arg0: i32, %arg1: i32) -> (i32, i32) {
    %c0_i32 = arith.constant 0 : i32
    %c0_i32_0 = arith.constant 0 : i32
    %c0_i32_1 = arith.constant 0 : i32
    return %c0_i32, %c0_i32_0 : i32, i32
  }
  func.func @transform_4(%arg0: i32, %arg1: i32) -> (i32, i32) {
    %c0_i32 = arith.constant 0 : i32
    %c0_i32_0 = arith.constant 0 : i32
    %c0_i32_1 = arith.constant 0 : i32
    return %c0_i32, %c0_i32_0 : i32, i32
  }
  func.func @transform_5(%arg0: i32, %arg1: i32) -> (i32, i32) {
    %c0_i32 = arith.constant 0 : i32
    %c0_i32_0 = arith.constant 0 : i32
    %c0_i32_1 = arith.constant 0 : i32
    return %c0_i32, %c0_i32_0 : i32, i32
  }
  func.func @transform_6(%arg0: i32, %arg1: i32) -> (i32, i32) {
    %c0_i32 = arith.constant 0 : i32
    %c0_i32_0 = arith.constant 0 : i32
    %c0_i32_1 = arith.constant 0 : i32
    return %c0_i32, %c0_i32_0 : i32, i32
  }
  func.func @transform_7(%arg0: i32, %arg1: i32) -> (i32, i32) {
    %c0_i32 = arith.constant 0 : i32
    %c0_i32_0 = arith.constant 0 : i32
    %c0_i32_1 = arith.constant 0 : i32
    return %c0_i32, %c0_i32_0 : i32, i32
  }
  func.func @transform_8(%arg0: i32, %arg1: i32) -> (i32, i32) {
    %c0_i32 = arith.constant 0 : i32
    %c0_i32_0 = arith.constant 0 : i32
    %c0_i32_1 = arith.constant 0 : i32
    return %c0_i32, %c0_i32_0 : i32, i32
  }
  func.func @transform_9(%arg0: i32, %arg1: i32) -> (i32, i32, i32, i32) {
    %c0_i32 = arith.constant 0 : i32
    %c0_i32_0 = arith.constant 0 : i32
    %c0_i32_1 = arith.constant 0 : i32
    return %arg0, %c0_i32, %arg1, %c0_i32_0 : i32, i32, i32, i32
  }
  func.func @transform_10(%arg0: i32, %arg1: i32) -> (i32, i32, i32, i32, i32) {
    %c0_i32 = arith.constant 0 : i32
    %c0_i32_0 = arith.constant 0 : i32
    %c0_i32_1 = arith.constant 0 : i32
    %c0_i32_2 = arith.constant 0 : i32
    return %arg0, %c0_i32, %c0_i32_0, %arg1, %c0_i32_1 : i32, i32, i32, i32, i32
  }
}

</mosaic_0001>

<bundles_post_ra>
// kernel: tpu_custom_call.1
= control target key start
LH: loop header
LB: loop body
LE: loop exit
PB: predicated region body
PF: predicated region fallthrough
CT: control target
= control target key end

     0   :  { %s1820_s0 = inlined_call_operand.hbm [shape: f32[2,8,32], index: 0, kind: input, shape index: {}]   ;;  %s1821_s1 = inlined_call_operand.vmem [shape: f32[1,32], index: 1, kind: input, shape index: {}]   ;;  %s1822_s2 = inlined_call_operand.vmem [shape: f32[1,32], index: 2, kind: input, shape index: {}]   ;;  %s1823_s3 = inlined_call_operand.hbm [shape: bf16[32,32], index: 3, kind: input, shape index: {}]   ;;  %s1824_s4 = inlined_call_operand.hbm [shape: f32[1,32], index: 4, kind: input, shape index: {}]   ;;  %s1825_s5 = inlined_call_operand.vmem [shape: bf16[32,32], index: 5, kind: input, shape index: {}]   ;;  %s1826_s6 = inlined_call_operand.vmem [shape: f32[1,32], index: 6, kind: input, shape index: {}]   ;;  %s1827_s7 = inlined_call_operand.hbm [shape: bf16[32,32], index: 7, kind: input, shape index: {}]   ;;  %s1828_s8 = inlined_call_operand.vmem [shape: f32[1,32], index: 8, kind: input, shape index: {}]   ;;  %s1829_s9 = inlined_call_operand.hbm [shape: bf16[2,4,8,8], index: 9, kind: output, shape index: {0}]   ;;  %s1830_s10 = inlined_call_operand.hbm [shape: bf16[2,2,4,8,8], index: 10, kind: output, shape index: {1}]  }
   0x1   :  { %1840 = sst [smem:[#allocation21_spill]] %s1826_s6 }
   0x2   :  { %1841 = sst [smem:[#allocation22_spill]] %s1828_s8 }
   0x3   :  { %1842 = sst [smem:[#allocation23_spill]] %s1829_s9 }
   0x4   :  { %1843 = sst [smem:[#allocation24_spill]] %s1830_s10 }
   0x5   :  { %16 = vsyncpa [#allocation3], 0 }
   0x6   :  { %18 = vsyncpa [#allocation3 + $0x1], 0 }
   0x7   :  { %19 = vsyncpa [#allocation6], 0 }
   0x8   :  { %20 = vsyncpa [#allocation9], 0 }
   0x9   :  { %21 = vsyncpa [#allocation4], 0 }
   0xa   :  { %23 = vsyncpa [#allocation4 + $0x1], 0 }
   0xb   :  { %24 = vsyncpa [#allocation12], 0 }
   0xc   :  { %26 = vsyncpa [#allocation12 + $0x1], 0  ;;  %s1440_s13 = smov 0   ;;  %s1442_s14 = smov 0  }
   0xd   :  { %s1444_s15 = smov 0   ;;  %s1446_s16 = smov 0  }
   0xe   :  { %s1448_s17 = smov 0   ;;  %s1450_s18 = smov 0  }
   0xf LB: > { %1844 = sst [smem:[#allocation18_spill]] %s1348_s13  ;;  %s926_s19 = sadd.s32 4294967295, %s1368_s18   ;;  %s1368_s18 = sphi %s1450_s18, %s32_s18   ;;  %s1364_s17 = sphi %s1448_s17, %s1873_s17   ;;  %s1360_s16 = sphi %s1446_s16, %s1872_s16   ;;  %s1356_s15 = sphi %s1444_s15, %s1871_s15   ;;  %s1352_s14 = sphi %s1442_s14, %s1870_s14   ;;  %s1348_s13 = sphi %s1440_s13, %s1869_s13  }
  0x10   : > { %1845 = sst [smem:[#allocation19_spill]] %s1360_s16  ;;  %s927_s20 = sadd.s32 4294967294, %s1368_s18  }
  0x11   : > { %p66_p0 = scmp.ne.s32.totalorder %s1352_s14, %s1348_s13  ;;  %p1474_p1 = scmp.eq.s32.totalorder %s926_s19, 0 }
  0x12   : > { %p1478_p2 = scmp.eq.s32.totalorder %s926_s19, 1  ;;  %p266_p3 = scmp.eq.s32.totalorder %s927_s20, 1 }
  0x13   : > { %s1846_s21 = scalar_select %p1474_p1, 1, 0 }
  0x14   : > { %s1847_s22 = scalar_select %p1478_p2, 1, 0 }
  0x15   : > { %p1484_p4 = por %p1474_p1, %p66_p0  ;;  %p928_p5 = scmp.ge.s32.totalorder %s1368_s18, 1 }
  0x16   : > { %p1489_p6 = por %p266_p3, %p66_p0  ;;  %p301_p7 = scmp.lt.s32.totalorder %s1368_s18, 3 }
  0x17   : > { %s1848_s23 = scalar_select %p1484_p4, 1, 0 }
  0x18   : > { %s1849_s24 = scalar_select %p1489_p6, 1, 0 }
  0x19   : > { %p1494_p8 = pnand %p928_p5, %p301_p7  ;;  %s1370_s26 = smov [#allocation5]  }
  0x1a   : > { %1850 = sst [smem:[#allocation20_spill]] %s1849_s24  ;;  %s319_s27 = sshll.u32 %s1370_s26, 4  ;;  %s1498_s27 = int_to_ptr.vmem [resolvable:$true] %s319_s27 }
  0x1b   : > { %s1851_s25 = scalar_select %p1494_p8, 1, 0 }
  0x1c   : > { %p1033_p9 = pneg %p1494_p8  ;;  %s1371_s29 = smov [#allocation7]  }
  0x1d   : > { %s333_s30 = sshll.u32 %s1371_s29, 4  ;;  %s1372_s11 = smov [#allocation8]   ;;  %s1509_s30 = int_to_ptr.vmem [resolvable:$true] %s333_s30 }
  0x1e   : > { %p1505_p11 = pnand %p1033_p9, %p1474_p1  ;;  %s1511_s12 = sshll.u32 %s1372_s11, 4  ;;  %s350_s12 = int_to_ptr.vmem [resolvable:$true] %s1511_s12 }
  0x1f   : > { %s1132_s26 = scalar_lea.hbm %s1823_s3, 256 }
  0x20   : > { %p1133_p12 = scmp.ne.s32.totalorder %s1823_s3, %s1132_s26  ;;  %p1521_p13 = pneg %p1505_p11 }
  0x21   : > { %p1139_p5 = scmp.lt.u32.totalorder %s1132_s26, %s1823_s3 }
  0x22   : > { %p1135_p0 = pnand %p1521_p13, %p1133_p12 }
  0x24   : > { %p1136_p3 = pneg %p1135_p0 }
  0x26   : > { %p1141_p7 = pnand %p1139_p5, %p1136_p3 }
  0x28   : > { %1144 = shalt.err (!%p1141_p7)
}
  0x29   : > { %s1145_s13 = scalar_lea.vmem %s1498_s27, 256  ;;  %p1153_p1 = scmp.lt.s32.totalorder %s1498_s27, %s1498_s27 }
  0x2a   : > { %p1146_p9 = scmp.ne.s32.totalorder %s1498_s27, %s1145_s13  ;;  %p1154_p4 = scmp.lt.s32.totalorder %s1145_s13, %s1145_s13 }
  0x2c   : > { %p1148_p10 = pnand %p1146_p9, %p1521_p13  ;;  %p1155_p12 = por %p1154_p4, %p1153_p1 }
  0x2e   : > { %p1149_p6 = pneg %p1148_p10 }
  0x30   : > { %p1156_p0 = pnand %p1155_p12, %p1149_p6 }
  0x32   : > { %1159 = shalt.err (!%p1156_p0)
}
  0x33   : > { %s1373_s24 = smov 64   ;;  %s1374_s19 = smov 4  }
  0x34   : > { %1036 = dma.hbm_to_vmem [thread:$0]  (!%p1505_p11), %s1823_s3, 256, %s1498_s27, [#allocation6], %s1373_s24, %s1373_s24, %s1374_s19  }
  0x35   : > { %s1160_s13 = scalar_lea.hbm %s1824_s4, 16 }
  0x36   : > { %p1161_p1 = scmp.ne.s32.totalorder %s1824_s4, %s1160_s13  ;;  %p1167_p10 = scmp.lt.u32.totalorder %s1160_s13, %s1824_s4 }
  0x38   : > { %p1163_p4 = pnand %p1161_p1, %p1521_p13 }
  0x3a   : > { %p1164_p6 = pneg %p1163_p4 }
  0x3c   : > { %p1169_p3 = pnand %p1167_p10, %p1164_p6 }
  0x3e   : > { %1172 = shalt.err (!%p1169_p3)
}
  0x3f   : > { %s1173_s27 = scalar_lea.vmem %s1509_s30, 16  ;;  %s1180_s9 = scalar_lea.vmem %s1509_s30, 32 }
  0x40   : > { %p1174_p5 = scmp.ne.s32.totalorder %s1509_s30, %s1173_s27  ;;  %p1181_p12 = scmp.lt.s32.totalorder %s1509_s30, %s1509_s30 }
  0x41   : > { %p1182_p0 = scmp.lt.s32.totalorder %s1180_s9, %s1173_s27 }
  0x42   : > { %p1176_p7 = pnand %p1174_p5, %p1521_p13 }
  0x43   : > { %p1183_p1 = por %p1182_p0, %p1181_p12 }
  0x44   : > { %p1177_p9 = pneg %p1176_p7 }
  0x46   : > { %p1184_p4 = pnand %p1183_p1, %p1177_p9 }
  0x48   : > { %1187 = shalt.err (!%p1184_p4)
}
  0x49   : > { %1039 = dma.hbm_to_vmem [thread:$0]  (!%p1505_p11), %s1824_s4, 16, %s1509_s30, [#allocation6]  }
  0x4a   : > { %s1188_s26 = scalar_lea.hbm %s1827_s7, 256 }
  0x4b   : > { %p1189_p6 = scmp.ne.s32.totalorder %s1827_s7, %s1188_s26  ;;  %p1195_p5 = scmp.lt.u32.totalorder %s1188_s26, %s1827_s7 }
  0x4d   : > { %p1191_p10 = pnand %p1189_p6, %p1521_p13 }
  0x4f   : > { %p1192_p3 = pneg %p1191_p10 }
  0x51   : > { %p1197_p7 = pnand %p1195_p5, %p1192_p3 }
  0x53   : > { %1200 = shalt.err (!%p1197_p7)
}
  0x54   : > { %s1201_s9 = scalar_lea.vmem %s350_s12, 256  ;;  %p1209_p1 = scmp.lt.s32.totalorder %s350_s12, %s350_s12 }
  0x55   : > { %p1202_p9 = scmp.ne.s32.totalorder %s350_s12, %s1201_s9  ;;  %p1210_p4 = scmp.lt.s32.totalorder %s1201_s9, %s1201_s9 }
  0x57   : > { %p1204_p12 = pnand %p1202_p9, %p1521_p13  ;;  %p1211_p8 = por %p1210_p4, %p1209_p1 }
  0x59   : > { %p1205_p0 = pneg %p1204_p12 }
  0x5b   : > { %p1212_p2 = pnand %p1211_p8, %p1205_p0 }
  0x5d   : > { %1215 = shalt.err (!%p1212_p2)
}
  0x5e   : > { %1042 = dma.hbm_to_vmem [thread:$0]  (!%p1505_p11), %s1827_s7, 256, %s350_s12, [#allocation9], %s1373_s24, %s1373_s24, %s1374_s19  }
  0x5f   : > { %s53_s10 = sadd.s32 1, %s1356_s15  ;;  %s44_s28 = sadd.s32 1, %s1364_s17 }
  0x60   : > { %p60_p2 = scmp.ne.s32.totalorder %s1356_s15, %s1352_s14  ;;  %p46_p8 = scmp.ge.s32.totalorder %s44_s28, 2 }
  0x61   : > { %p61_p13 = scmp.eq.s32.totalorder %s1368_s18, 0  ;;  %p1854_p6 = scmp.ne.s32.totalorder %s1847_s22, 0 }
  0x62   : > { %p1057_p3 = scmp.lt.s32.totalorder %s1368_s18, 2  ;;  %s1875_s28 = smov (%p46_p8, %s44_s28), 0 }
  0x63   : > { %p1598_p10 = por %p1854_p6, %p60_p2  ;;  %p62_p5 = por %p61_p13, %p60_p2 }
  0x64   : > { %s366_s16 = sand.u32 1, %s1356_s15   ;;  %s48_s20 = ssub.s32 %s1364_s17, %s1875_s28 }
  0x65   : > { %p51_p7 = scmp.eq.s32.totalorder %s48_s20, 0  ;;  %s933_s12 = sshll.u32 %s366_s16, 3 }
  0x66   : > { %s934_s24 = sshll.u32 %s1364_s17, 7  ;;  %s370_s11 = scalar_lea.vmem [#allocation2], %s933_s12 }
  0x67   : > { %s1610_s19 = scalar_select %p51_p7, %s1356_s15, %s53_s10  }
  0x68   : > { %s1615_s22 = scalar_lea.hbm %s1820_s0, %s934_s24  ;;  %s378_s13 = sshll.u32 %s370_s11, 4  ;;  %s1617_s13 = int_to_ptr.vmem [resolvable:$true] %s378_s13 }
  0x69   : > { %p1621_p11 = pnand %p1057_p3, %p62_p5  ;;  %s367_s9 = scalar_lea.sflag [#allocation3], %s366_s16 }
  0x6a   : > { %s1216_s30 = scalar_lea.hbm %s1615_s22, 128  ;;  %s1221_s20 = scalar_lea.hbm %s1820_s0, 256 }
  0x6b   : > { %p1217_p9 = scmp.ne.s32.totalorder %s1615_s22, %s1216_s30  ;;  %p1218_p12 = pneg %p1621_p11 }
  0x6c   : > { %p1222_p4 = scmp.lt.u32.totalorder %s1615_s22, %s1820_s0  ;;  %p1223_p2 = scmp.lt.u32.totalorder %s1221_s20, %s1216_s30 }
  0x6d   : > { %p1219_p0 = pnand %p1218_p12, %p1217_p9  ;;  %p1225_p13 = scmp.lt.u32.totalorder %s1216_s30, %s1615_s22 }
  0x6e   : > { %p1224_p8 = por %p1223_p2, %p1222_p4 }
  0x6f   : > { %p1220_p1 = pneg %p1219_p0 }
  0x70   : > { %p1226_p6 = por %p1225_p13, %p1224_p8 }
  0x72   : > { %p1227_p3 = pnand %p1226_p6, %p1220_p1 }
  0x74   : > { %1230 = shalt.err (!%p1227_p3)
}
  0x75   : > { %s1231_s16 = scalar_lea.vmem %s1617_s13, 128  ;;  %s1375_s26 = smov [#allocation2]  }
  0x76   : > { %p1232_p5 = scmp.ne.s32.totalorder %s1617_s13, %s1231_s16  ;;  %s1236_s29 = sshll.u32 %s1375_s26, 4  ;;  %s1237_s29 = int_to_ptr.vmem [resolvable:$false] %s1236_s29 }
  0x77   : > { %s1238_s11 = scalar_lea.vmem %s1237_s29, 256  ;;  %p1239_p0 = scmp.lt.s32.totalorder %s1617_s13, %s1237_s29 }
  0x78   : > { %p1234_p7 = pnand %p1232_p5, %p1218_p12  ;;  %p1240_p4 = scmp.lt.s32.totalorder %s1238_s11, %s1231_s16 }
  0x7a   : > { %p1235_p9 = pneg %p1234_p7  ;;  %p1241_p2 = por %p1240_p4, %p1239_p0 }
  0x7c   : > { %p1242_p8 = pnand %p1241_p2, %p1235_p9 }
  0x7e   : > { %1245 = shalt.err (!%p1242_p8)
}
  0x7f   : > { %1046 = dma.hbm_to_vmem [thread:$0]  (!%p1621_p11), %s1615_s22, 128, %s1617_s13, %s367_s9  }
  0x80   : > { %p1857_p1 = scmp.ne.s32.totalorder %s1851_s25, 0 }
  0x81   : > { %s1653_s30 = sand.u32 (!%p1857_p1), 1, %s1352_s14   ;;  %p1858_p12 = scmp.ne.s32.totalorder (!%p1857_p1), %s1848_s23, 0 }
  0x82   : > { %387 = sbr.rel (%p1857_p1) target bundleno = 861 (0x35d), region = 56  ;;  %s936_s6 = sshll.u32 (!%p1857_p1), %s1653_s30, 3 }
  0x83   : > { %s390_s10 = scalar_lea.sflag (!%p1857_p1), [#allocation3], %s1653_s30  ;;  %s393_s20 = scalar_lea.vmem (!%p1857_p1), [#allocation2], %s936_s6 }
  0x89   : > { %1327 = dma.done.wait (%p1858_p12), %s390_s10, 128  }
  0x8a   : > { %1329 = vsyncadd (%p1858_p12), %s390_s10, 4294967168  ;;  %p1859_p13 = scmp.ne.s32.totalorder %s1846_s21, 0 }
  0x8c   : > { %1331 = dma.done.wait (%p1859_p13), [#allocation6], 272  }
  0x8d   : > { %1333 = vsyncadd (%p1859_p13), [#allocation6], 4294967024 }
  0x8e   : > { %1335 = dma.done.wait (%p1859_p13), [#allocation9], 256  }
  0x8f   : > { %1337 = vsyncadd (%p1859_p13), [#allocation9], 4294967040  ;;  %vm451_vm0 = vcmask 261120   ;;  %v448_v0 = vld [vmem:[%s393_s20] sm:$0xff]  ;;  %v1122_v7 = vld [vmem:[#allocation5] sm:$0xff]   ;;  %v1376_v9 = vmov 0.0  }
  0x90   : > { %v452_v1 = vsel %vm451_vm0, %v448_v0, 0.0  ;;  %v1123_v8 = vld [vmem:[%s1825_s5] sm:$0xff]   ;;  %991 = vmatprep.subr.bf16.mxu0 %v1376_v9  ;;  %999 = vmatprep.subr.bf16.mxu1 %v1376_v9  ;;  %v1124_v10 = vld [vmem:[#allocation5 + $0x8] sm:$0xff]   ;;  %v1125_v11 = vld [vmem:[%s1825_s5 + $0x8] sm:$0xff]   ;;  %vm1377_vm1 = vmmov 0   ;;  %s940_s24 = sshll.u32 %s1653_s30, 4 }
  0x91   : > { %453 = vadd.xlane.f32.xlu0 %v452_v1  ;;  %992 = vmatpush3.bf16.msra.mxu0 %v1122_v7  ;;  %v942_v21 = vld [vmem:[%s1821_s1] ss:$0 sm:$0xff]  ;;  %v1126_v26 = vld [vmem:[#allocation8] sm:$0xff]   ;;  %v1127_v28 = vld [vmem:[#allocation8 + $0x8] sm:$0xff]   ;;  %s1860_s29 = sld [smem:[#allocation21_spill]]  ;;  %s941_s11 = sshll.u32 %s1653_s30, 5 }
  0x92   : > { %1000 = vmatpush3.bf16.msra.mxu1 %v1123_v8  ;;  %993 = vmatprep.subr.bf16.mxu0 %v1376_v9  ;;  %v943_v23 = vld [vmem:[%s1822_s2] ss:$0 sm:$0xff]  ;;  %vm681_vm4 = vcmask 60416   ;;  %s1694_s6 = scalar_lea.vmem [#allocation10], %s940_s24  ;;  %s1698_s10 = scalar_lea.vmem [#allocation11], %s941_s11 }
  0x93   : > { %1001 = vmatprep.subr.bf16.mxu1 %v1376_v9  ;;  %995 = vmatprep.mubr.msk.bf16.mxu0 %vm1377_vm1, %v1376_v9  ;;  %v944_v29 = vld [vmem:[#allocation7] ss:$0 sm:$0xff]  ;;  %s1378_s20 = smov 120   ;;  %s1861_s21 = sld [smem:[#allocation22_spill]] }
  0x94   : > { %1003 = vmatprep.mubr.msk.bf16.mxu1 %vm1377_vm1, %v1376_v9  ;;  %s1379_s22 = smov 112   ;;  %s1862_s13 = sld [smem:[#allocation19_spill]] }
  0x95   : > { %994 = vmatpush3.bf16.msra.mxu0 %v1124_v10  ;;  %s1380_s27 = smov 104   ;;  %s762_s9 = sshll.u32 %s1694_s6, 4  ;;  %s1717_s9 = int_to_ptr.vmem [resolvable:$true] %s762_s9 }
  0x96   : > { %1002 = vmatpush3.bf16.msra.mxu1 %v1125_v11  ;;  %1007 = vmatprep.subr.bf16.mxu0 %v1376_v9  ;;  %s1863_s26 = sld [smem:[#allocation23_spill]]  ;;  %s743_s11 = scalar_lea.sflag [#allocation4], %s1653_s30 }
  0x97   : > { %v948_v30 = vld [vmem:[%s1860_s29] ss:$0 sm:$0xff]  ;;  %s1381_s23 = smov [#allocation10]  }
  0x98   : > { %s1250_s25 = sshll.u32 %s1381_s23, 4  ;;  %s1251_s25 = int_to_ptr.vmem [resolvable:$false] %s1250_s25 }
  0x99   : > { %v952_v43 = vld [vmem:[%s1861_s21] ss:$0 sm:$0xff]  ;;  %s1252_s21 = scalar_lea.vmem %s1251_s25, 512  ;;  %p1253_p5 = scmp.lt.s32.totalorder %s1717_s9, %s1251_s25 }
  0x9a   : > { %s980_s12 = sshll.u32 %s1862_s13, 8 }
  0x9c   : > { %s1724_s29 = scalar_lea.hbm %s1863_s26, %s980_s12 }
 0x11e   : > { %v454_v2 = vpop.xlane.xlu0 %453 }
 0x11f   : > { %v456_v3 = vmul.f32 0.03125, %v454_v2 }
 0x121   : > { %v457_v4 = vsub.f32 %v448_v0, %v456_v3 }
 0x123   : > { %v458_v5 = vmul.f32 %v457_v4, %v457_v4 }
 0x125   : > { %v459_v6 = vsel %vm451_vm0, %v458_v5, 0.0 }
 0x126   : > { %460 = vadd.xlane.f32.xlu0 %v459_v6 }
 0x1b3   : > { %v461_v12 = vpop.xlane.xlu0 %460 }
 0x1b4   : > { %v462_v13 = vmul.f32 0.032258064, %v461_v12 }
 0x1b6   : > { %1128 = vrsqrt.f32 %v462_v13  ;;  %vm465_vm2 = vcmp.eq.f32.partialorder %v462_v13, inf  ;;  %v468_v16 = vand.u32 2147483648, %v462_v13  ;;  %vm467_vm3 = vcmp.eq.f32.partialorder %v462_v13, 0.0 }
 0x1c0   : > { %v1129_v14 = vpop.eup %1128 }
 0x1c1   : > { %v464_v15 = vmul.f32 %v1129_v14, %v462_v13 }
 0x1c3   : > { %v466_v17 = vsel %vm465_vm2, %v462_v13, %v464_v15 }
 0x1c4   : > { %v469_v18 = vsel %vm467_vm3, %v468_v16, %v466_v17 }
 0x1c5   : > { %v470_v19 = vadd.f32 1e-06, %v469_v18 }
 0x1c7   : > { %1130 = vrcp.f32 %v470_v19 }
 0x1d1   : > { %v1131_v20 = vpop.eup %1130 }
 0x1d2   : > { %v472_v22 = vmul.f32 %v1131_v20, %v457_v4 }
 0x1d4   : > { %v479_v24 = vmul.f32 %v942_v21, %v472_v22 }
 0x1d6   : > { %v486_v25 = vadd.f32 %v943_v23, %v479_v24 }
 0x1d8   : > { %v487_v27 = vpack.c.bf16 %v486_v25, %v486_v25 }
 0x1da   : > { %996 = vmatmul.mubr.msk.bf16.vlgmr.msra.gmra.mrb[0].mxu0 %vm451_vm0, %v487_v27  ;;  %1004 = vmatmul.mubr.msk.bf16.vlgmr.msra.gmra.mrb[0].mxu1 %vm451_vm0, %v487_v27 }
 0x1db   : > { %1008 = vmatpush3.bf16.msra.mxu0 %v1126_v26  ;;  %1011 = vmatprep.mubr.msk.bf16.mxu0 %vm1377_vm1, %v1376_v9 }
 0x1dc   : > { %1009 = vmatprep.subr.bf16.mxu0 %v1376_v9 }
 0x1df   : > { %1010 = vmatpush3.bf16.msra.mxu0 %v1127_v28 }
 0x1e2   : > { %1012 = vmatmul.mubr.msk.bf16.vlgmr.msra.gmra.mrb[4].mxu0 %vm451_vm0, %v487_v27 }
 0x2ad   : > { %v548_v31 = vpop.f32.mrb[0].mxu0  ;;  %v611_v32 = vpop.f32.mrb[0].mxu1 }
 0x2ae   : > { %v549_v33 = vadd.f32 %v944_v29, %v548_v31  ;;  %v612_v34 = vadd.f32 %v948_v30, %v611_v32  ;;  %v997_v35 = vpop.f32.mrb[1].mxu0  ;;  %v1005_v36 = vpop.f32.mrb[1].mxu1 }
 0x2af   : > { %v551_v37 = vpop.f32.mrb[2].mxu0  ;;  %v614_v38 = vpop.f32.mrb[2].mxu1 }
 0x2b0   : > { %v680_v39 = vpack.c.bf16 %v549_v33, %v549_v33  ;;  %v683_v40 = vpack.c.bf16 %v612_v34, %v612_v34  ;;  %v998_v41 = vpop.f32.mrb[3].mxu0  ;;  %v1006_v42 = vpop.f32.mrb[3].mxu1 }
 0x2b2   : > { %682 = vst.msk [vmem:[%s1694_s6] sm:$0xf] %vm681_vm4, %v680_v39  ;;  %684 = vst.msk [vmem:[%s1698_s10] sm:$0xf] %vm681_vm4, %v683_v40  ;;  %691 = vrot.lane.b32.xlu1 %v680_v39, %s1378_s20 }
 0x2b5   : > { %v674_v44 = vpop.f32.mrb[4].mxu0 }
 0x2b6   : > { %v675_v45 = vadd.f32 %v952_v43, %v674_v44  ;;  %699 = vrot.lane.b32.xlu1 %v683_v40, %s1378_s20  ;;  %v1013_v46 = vpop.f32.mrb[5].mxu0 }
 0x2b7   : > { %v677_v47 = vpop.f32.mrb[6].mxu0 }
 0x2b8   : > { %v685_v48 = vpack.c.bf16 %v675_v45, %v675_v45  ;;  %v1014_v49 = vpop.f32.mrb[7].mxu0 }
 0x2ba   : > { %956 = vst.msk [vmem:[%s1698_s10 + $0x10] sm:$0xf] %vm681_vm4, %v685_v48  ;;  %712 = vrot.lane.b32.xlu1 %v680_v39, %s1379_s22  ;;  %707 = vrot.lane.b32.xlu0 %v685_v48, %s1378_s20  ;;  %s1246_s20 = scalar_lea.vmem %s1717_s9, 256 }
 0x2bb   : > { %p1247_p11 = scmp.ne.s32.totalorder %s1717_s9, %s1246_s20  ;;  %p1254_p7 = scmp.lt.s32.totalorder %s1252_s21, %s1246_s20 }
 0x2bd   : > { %p1248_p6 = pnand %p1247_p11, %p1598_p10  ;;  %p1255_p9 = por %p1254_p7, %p1253_p5 }
 0x2be   : > { %717 = vrot.lane.b32.xlu1 %v683_v40, %s1379_s22 }
 0x2bf   : > { %p1249_p3 = pneg %p1248_p6 }
 0x2c1   : > { %p1256_p0 = pnand %p1255_p9, %p1249_p3 }
 0x2c2   : > { %727 = vrot.lane.b32.xlu1 %v680_v39, %s1380_s27 }
 0x2c6   : > { %732 = vrot.lane.b32.xlu1 %v683_v40, %s1380_s27 }
 0x2ca   : > { %722 = vrot.lane.b32.xlu1 %v685_v48, %s1379_s22 }
 0x2ce   : > { %737 = vrot.lane.b32.xlu1 %v685_v48, %s1380_s27 }
 0x324   : > { %v692_v50 = vpop.permute.xlu1 %691 }
 0x325   : > { %958 = vst.msk [vmem:[%s1694_s6 + $0x4] sm:$0xf] %vm681_vm4, %v692_v50 }
 0x328   : > { %v700_v51 = vpop.permute.xlu1 %699 }
 0x329   : > { %960 = vst.msk [vmem:[%s1698_s10 + $0x4] sm:$0xf] %vm681_vm4, %v700_v51 }
 0x32c   : > { %v713_v52 = vpop.permute.xlu1 %712  ;;  %v708_v53 = vpop.permute.xlu0 %707 }
 0x32d   : > { %963 = vst.msk [vmem:[%s1694_s6 + $0x8] sm:$0xf] %vm681_vm4, %v713_v52  ;;  %962 = vst.msk [vmem:[%s1698_s10 + $0x14] sm:$0xf] %vm681_vm4, %v708_v53 }
 0x330   : > { %v718_v54 = vpop.permute.xlu1 %717 }
 0x331   : > { %964 = vst.msk [vmem:[%s1698_s10 + $0x8] sm:$0xf] %vm681_vm4, %v718_v54 }
 0x334   : > { %v728_v55 = vpop.permute.xlu1 %727 }
 0x335   : > { %966 = vst.msk [vmem:[%s1694_s6 + $0xc] sm:$0xf] %vm681_vm4, %v728_v55 }
 0x336   : > { %1259 = shalt.err (!%p1256_p0)
}
 0x337   : > { %s1260_s6 = scalar_lea.hbm %s1724_s29, 256  ;;  %s1264_s12 = scalar_lea.hbm %s1863_s26, 512 }
 0x338   : > { %p1261_p4 = scmp.ne.s32.totalorder %s1724_s29, %s1260_s6  ;;  %p1265_p1 = scmp.lt.u32.totalorder %s1724_s29, %s1863_s26 }
 0x339   : > { %p1266_p12 = scmp.lt.u32.totalorder %s1264_s12, %s1260_s6  ;;  %p1268_p11 = scmp.lt.u32.totalorder %s1260_s6, %s1724_s29 }
 0x33a   : > { %p1262_p2 = pnand %p1261_p4, %p1598_p10 }
 0x33b   : > { %p1267_p13 = por %p1266_p12, %p1265_p1 }
 0x33c   : > { %p1263_p8 = pneg %p1262_p2 }
 0x33d   : > { %p1269_p6 = por %p1268_p11, %p1267_p13 }
 0x33f   : > { %p1270_p3 = pnand %p1269_p6, %p1263_p8 }
 0x341   : > { %1273 = shalt.err (!%p1270_p3)
}
 0x342   : > { %s1382_s20 = smov 64   ;;  %s1383_s23 = smov 4   ;;  %v733_v56 = vpop.permute.xlu1 %732 }
 0x343   : > { %1029 = dma.vmem_to_hbm [thread:$0]  (%p1598_p10), %s1717_s9, 256, %s1724_s29, %s743_s11, %s1382_s20, %s1382_s20, %s1383_s23  }
 0x344   : > { %967 = vst.msk [vmem:[%s1698_s10 + $0xc] sm:$0xf] %vm681_vm4, %v733_v56  ;;  %s981_s25 = sshll.u32 %s1862_s13, 9  ;;  %s779_s21 = sshll.u32 %s1698_s10, 4  ;;  %s1766_s21 = int_to_ptr.vmem [resolvable:$true] %s779_s21 }
 0x345   : > { %s1864_s27 = sld [smem:[#allocation24_spill]]  ;;  %s748_s9 = scalar_lea.sflag [#allocation12], %s1653_s30 }
 0x346   : > { %v723_v57 = vpop.permute.xlu1 %722  ;;  %s1274_s29 = scalar_lea.vmem %s1766_s21, 512  ;;  %s1384_s13 = smov [#allocation11]  }
 0x347   : > { %965 = vst.msk [vmem:[%s1698_s10 + $0x18] sm:$0xf] %vm681_vm4, %v723_v57  ;;  %p1275_p5 = scmp.ne.s32.totalorder %s1766_s21, %s1274_s29  ;;  %s1278_s11 = sshll.u32 %s1384_s13, 4  ;;  %s1279_s11 = int_to_ptr.vmem [resolvable:$false] %s1278_s11 }
 0x348   : > { %s1280_s24 = scalar_lea.vmem %s1279_s11, 1024  ;;  %p1281_p0 = scmp.lt.s32.totalorder %s1766_s21, %s1279_s11 }
 0x349   : > { %p1276_p7 = pnand %p1275_p5, %p1598_p10  ;;  %p1282_p4 = scmp.lt.s32.totalorder %s1280_s24, %s1274_s29 }
 0x34a   : > { %v738_v58 = vpop.permute.xlu1 %737 }
 0x34b   : > { %s1764_s12 = scalar_lea.hbm %s1864_s27, %s981_s25  ;;  %968 = vst.msk [vmem:[%s1698_s10 + $0x1c] sm:$0xf] %vm681_vm4, %v738_v58  ;;  %p1277_p9 = pneg %p1276_p7 }
 0x34c   : > { %p1283_p2 = por %p1282_p4, %p1281_p0 }
 0x34e   : > { %p1284_p8 = pnand %p1283_p2, %p1277_p9 }
 0x350   : > { %1287 = shalt.err (!%p1284_p8)
}
 0x351   : > { %s1288_s10 = scalar_lea.hbm %s1764_s12, 512  ;;  %s1292_s6 = scalar_lea.hbm %s1864_s27, 1024 }
 0x352   : > { %p1289_p1 = scmp.ne.s32.totalorder %s1764_s12, %s1288_s10  ;;  %p1293_p11 = scmp.lt.u32.totalorder %s1764_s12, %s1864_s27 }
 0x353   : > { %p1294_p6 = scmp.lt.u32.totalorder %s1292_s6, %s1288_s10  ;;  %p1296_p5 = scmp.lt.u32.totalorder %s1288_s10, %s1764_s12 }
 0x354   : > { %p1290_p12 = pnand %p1289_p1, %p1598_p10 }
 0x355   : > { %p1295_p3 = por %p1294_p6, %p1293_p11 }
 0x356   : > { %p1291_p13 = pneg %p1290_p12 }
 0x357   : > { %p1297_p7 = por %p1296_p5, %p1295_p3 }
 0x359   : > { %p1298_p9 = pnand %p1297_p7, %p1291_p13 }
 0x35b   : > { %1301 = shalt.err (!%p1298_p9)
}
 0x35c   : > { %1030 = dma.vmem_to_hbm [thread:$0]  (%p1598_p10), %s1766_s21, 512, %s1764_s12, %s748_s9, %s1382_s20, %s1382_s20, %s1383_s23  }
 0x35d PF: > { %s1865_s29 = sld [smem:[#allocation18_spill]]  ;;  %s1866_s11 = sld [smem:[#allocation20_spill]] }
 0x35e   : > { %p1868_p4 = scmp.ge.s32.totalorder %s1368_s18, 2 }
 0x363   : > { %s794_s24 = sand.u32 1, %s1865_s29   ;;  %p1867_p0 = scmp.ne.s32.totalorder %s1866_s11, 0 }
 0x364   : > { %s795_s10 = scalar_lea.sflag [#allocation4], %s794_s24 }
 0x365   : > { %p1048_p2 = pnand %p1868_p4, %p1867_p0 }
 0x367   : > { %1339 = dma.done.wait (!%p1048_p2), %s795_s10, 256  }
 0x368   : > { %1341 = vsyncadd (!%p1048_p2), %s795_s10, 4294967040  ;;  %s804_s8 = scalar_lea.sflag [#allocation12], %s794_s24 }
 0x369   : > { %1343 = dma.done.wait (!%p1048_p2), %s804_s8, 512  }
 0x36a   : > { %1345 = vsyncadd (!%p1048_p2), %s804_s8, 4294966784  ;;  %s32_s18 = sadd.s32 1, %s1368_s18   ;;  %s1869_s13 = smov %s1352_s14 }
 0x36b   : > { %p29_p8 = scmp.ge.s32.totalorder %s32_s18, 4   ;;  %s1870_s14 = smov %s1356_s15 }
 0x36c   : > { %s1871_s15 = smov %s1610_s19  ;;  %s1872_s16 = smov %s1364_s17 }
 0x36d   : > { %s1873_s17 = smov %s1875_s28  ;;  %31 = sbr.rel (!%p29_p8) target bundleno = 15 (0xf), region = 140 }
 0x374   :  { %809 = vsyncpa [#allocation3], 1 }
 0x375   :  { %811 = vsyncpa [#allocation3 + $0x1], 1 }
 0x376   :  { %812 = vsyncpa [#allocation6], 1 }
 0x377   :  { %813 = vsyncpa [#allocation9], 1 }
 0x378   :  { %814 = vsyncpa [#allocation4], 1 }
 0x379   :  { %816 = vsyncpa [#allocation4 + $0x1], 1 }
 0x37a   :  { %817 = vsyncpa [#allocation12], 1 }
 0x37b   :  { %819 = vsyncpa [#allocation12 + $0x1], 1 }

</bundles_post_ra>
